<compile_context>
chip_gen: v7x
topology: tpu7x:2x2x1
jax: 0.10.0
libtpu: 0.0.40
codegen_flags: <defaults>
</compile_context>

<pallas_src>
import functools
import math

import jax
import jax.numpy as jnp
from jax.experimental import pallas as pl
from jax.experimental.pallas import tpu as pltpu

# --- module hyperparameters (TanhActor defaults) ---
MEAN_MIN, MEAN_MAX = -7.0, 7.0
LOGSTD_MIN, LOGSTD_MAX = -5.0, 2.0
EPS = 1e-6
INITIAL_STD_SCALER = 1.0

_HALF_LOG_2PI = 0.5 * math.log(2.0 * math.pi)
_LOG_SCALER = math.log(INITIAL_STD_SCALER)


def _round_up(n, m):
    return ((n + m - 1) // m) * m


def _pad2(a, rows, cols):
    pr, pc = rows - a.shape[0], cols - a.shape[1]
    if pr == 0 and pc == 0:
        return a
    return jnp.pad(a, ((0, pr), (0, pc)))


def _tanh_actor_kernel(x_ref, w1_ref, w2_ref, wh_ref, b_ref, noise_ref, out_ref,
                       *, H, A_pad, A):
    # fused bias row: [b1(H) | b2(H) | b_mean(A_pad) | b_logstd(A_pad)]
    b1 = b_ref[:, 0:H]
    b2 = b_ref[:, H:2 * H]
    bm = b_ref[:, 2 * H:2 * H + A_pad]
    bs = b_ref[:, 2 * H + A_pad:2 * H + 2 * A_pad]

    # ---- fc_layers: Linear -> ReLU -> Linear -> ReLU (MXU + VPU) ----
    h = jnp.dot(x_ref[...], w1_ref[...], preferred_element_type=jnp.float32) + b1
    h = jnp.maximum(h, 0.0).astype(w2_ref.dtype)
    h = jnp.dot(h, w2_ref[...], preferred_element_type=jnp.float32) + b2
    h = jnp.maximum(h, 0.0).astype(wh_ref.dtype)

    # ---- mean / logstd heads: one fused matmul, both halves 128-aligned ----
    heads = jnp.dot(h, wh_ref[...], preferred_element_type=jnp.float32)
    means = jnp.clip(heads[:, :A_pad] + bm, MEAN_MIN, MEAN_MAX)
    logstd = jnp.clip(heads[:, A_pad:] + bs, LOGSTD_MIN, LOGSTD_MAX)
    std = jnp.exp(logstd) * INITIAL_STD_SCALER

    # ---- reparameterized sample + tanh squashing (EUP) ----
    noise = noise_ref[...]
    pretanh = means + std * noise
    action = jnp.tanh(pretanh)
    det = jnp.tanh(means)

    # mask selecting the real action lanes (padded lanes A..A_pad contribute 0)
    lane = jax.lax.broadcasted_iota(jnp.int32, (1, A_pad), 1)
    valid = (lane < A).astype(jnp.float32)

    # Independent(Normal).log_prob: (pretanh - mean)/std == noise by
    # construction and log(std) == logstd + log(initial_std_scaler); the
    # constant terms are folded out of the per-element sum (XLU reduce).
    nlp = (-0.5 * noise * noise - logstd) * valid
    pre_lp = jnp.sum(nlp, axis=-1, keepdims=True) - A * (_HALF_LOG_2PI + _LOG_SCALER)

    # TODO(synk): naive log(1 - tanh(x)^2 + eps) matches the PyTorch reference
    # but saturates for |pretanh| >~ 10; stable form is 2*(log2 - x - softplus(-2x)).
    ldj = jnp.sum(jnp.log(1.0 - action * action + EPS) * valid,
                  axis=-1, keepdims=True)
    logp = pre_lp - ldj

    # lane-dense packed output slab: [tanh(mean) | action | log_prob(broadcast)]
    out_ref[:, 0:A_pad] = det
    out_ref[:, A_pad:2 * A_pad] = action
    out_ref[:, 2 * A_pad:3 * A_pad] = jnp.broadcast_to(logp, det.shape)


def tanh_actor_forward(x, params, noise, *, tile_b=512, use_bf16_matmul=False):
    """x: (B, state_dim) f32; noise: (B, action_dim) f32 (N(0,1) draws).

    Returns ((deterministic_action, action, log_prob), None) matching the
    PyTorch module: shapes (B, A), (B, A), (B,); network_state is None.
    """
    w1, b1, w2, b2, wm, bm, ws, bs = params
    B, S = x.shape
    A = noise.shape[-1]
    H = w1.shape[1]

    H_PAD = _round_up(H, 128)
    A_PAD = _round_up(A, 128)

    f32 = jnp.float32
    # zero-pad hidden/action dims to 128-lane alignment (mathematically exact)
    w1p = _pad2(w1.astype(f32), S, H_PAD)
    w2p = _pad2(w2.astype(f32), H_PAD, H_PAD)
    w_heads = jnp.concatenate(
        [_pad2(wm.astype(f32), H_PAD, A_PAD), _pad2(ws.astype(f32), H_PAD, A_PAD)],
        axis=1)                                                  # (H_PAD, 2*A_PAD)
    biases = jnp.concatenate(
        [_pad2(b1.astype(f32), 1, H_PAD), _pad2(b2.astype(f32), 1, H_PAD),
         _pad2(bm.astype(f32), 1, A_PAD), _pad2(bs.astype(f32), 1, A_PAD)],
        axis=1)                                                  # (1, 2H+2A_PAD)

    # batch tiling (no BatchNorm in this module -> batch tiling is exact)
    B8 = _round_up(B, 8)
    TB = min(_round_up(tile_b, 8), B8)
    B_pad = _round_up(B, TB)
    xp = _pad2(x.astype(f32), B_pad, S)
    noise_p = _pad2(noise.astype(f32), B_pad, A_PAD)

    if use_bf16_matmul:  # recommended on v6e/v7x; keep f32 for exact parity
        xp = xp.astype(jnp.bfloat16)
        w1p = w1p.astype(jnp.bfloat16)
        w2p = w2p.astype(jnp.bfloat16)
        w_heads = w_heads.astype(jnp.bfloat16)

    grid = (B_pad // TB,)
    flops = 2 * B_pad * (S * H_PAD + H_PAD * H_PAD + H_PAD * 2 * A_PAD)
    transcendentals = 4 * B_pad * A_PAD  # exp, tanh(pretanh), tanh(mean), log
    bytes_accessed = sum(int(a.size) * a.dtype.itemsize
                         for a in (xp, w1p, w2p, w_heads, biases, noise_p))
    bytes_accessed += B_pad * 3 * A_PAD * 4

    kernel = functools.partial(_tanh_actor_kernel, H=H_PAD, A_pad=A_PAD, A=A)
    out = pl.pallas_call(
        kernel,
        grid=grid,
        in_specs=[
            pl.BlockSpec((TB, S), lambda i: (i, 0)),                      # x
            pl.BlockSpec((S, H_PAD), lambda i: (0, 0)),                   # w1
            pl.BlockSpec((H_PAD, H_PAD), lambda i: (0, 0)),               # w2
            pl.BlockSpec((H_PAD, 2 * A_PAD), lambda i: (0, 0)),           # heads
            pl.BlockSpec((1, 2 * H_PAD + 2 * A_PAD), lambda i: (0, 0)),   # biases
            pl.BlockSpec((TB, A_PAD), lambda i: (i, 0)),                  # noise
        ],
        out_specs=pl.BlockSpec((TB, 3 * A_PAD), lambda i: (i, 0)),
        out_shape=jax.ShapeDtypeStruct((B_pad, 3 * A_PAD), jnp.float32),
        compiler_params=pltpu.CompilerParams(dimension_semantics=("parallel",)),
        cost_estimate=pl.CostEstimate(flops=flops,
                                      transcendentals=transcendentals,
                                      bytes_accessed=bytes_accessed),
    )(xp, w1p, w2p, w_heads, biases, noise_p)

    out = out[:B]
    det = out[:, :A]
    act = out[:, A_PAD:A_PAD + A]
    logp = out[:, 2 * A_PAD]
    return (det, act, logp), None


def init_params(key, state_dim, action_dim, hidden_size):
    """kaiming_normal_ (fan_in, relu gain) like the PyTorch module; biases 0.
    Weights stored (in_features, out_features) so the kernel does x @ W."""
    ks = jax.random.split(key, 4)

    def kaiming(k, fan_in, fan_out):
        std = jnp.sqrt(2.0 / fan_in)
        return std * jax.random.normal(k, (fan_in, fan_out), jnp.float32)

    w1 = kaiming(ks[0], state_dim, hidden_size)
    b1 = jnp.zeros((1, hidden_size), jnp.float32)
    w2 = kaiming(ks[1], hidden_size, hidden_size)
    b2 = jnp.zeros((1, hidden_size), jnp.float32)
    wm = kaiming(ks[2], hidden_size, action_dim)
    bm = jnp.zeros((1, action_dim), jnp.float32)
    ws = kaiming(ks[3], hidden_size, action_dim)
    bs = jnp.zeros((1, action_dim), jnp.float32)
    return (w1, b1, w2, b2, wm, bm, ws, bs)


def _reference_forward(x, params, noise):
    """Pure-JAX replica of the PyTorch forward (naive formulas) for checking."""
    w1, b1, w2, b2, wm, bm, ws, bs = params
    h = jax.nn.relu(x @ w1 + b1)
    h = jax.nn.relu(h @ w2 + b2)
    mean = jnp.clip(h @ wm + bm, MEAN_MIN, MEAN_MAX)
    logstd = jnp.clip(h @ ws + bs, LOGSTD_MIN, LOGSTD_MAX)
    std = jnp.exp(logstd) * INITIAL_STD_SCALER
    pretanh = mean + std * noise
    action = jnp.tanh(pretanh)
    lp = -0.5 * ((pretanh - mean) / std) ** 2 - jnp.log(std) - _HALF_LOG_2PI
    lp = jnp.sum(lp, axis=-1)
    ldj = jnp.sum(jnp.log(1.0 - action ** 2 + EPS), axis=-1)
    return jnp.tanh(mean), action, lp - ldj


if __name__ == "__main__":
    B, STATE_DIM, ACTION_DIM, HIDDEN = 8, 16, 4, 256  # module default hidden_size

    key = jax.random.PRNGKey(0)
    k_x, k_p, k_n = jax.random.split(key, 3)

    x = jax.random.normal(k_x, (B, STATE_DIM), jnp.float32)
    params = init_params(k_p, STATE_DIM, ACTION_DIM, HIDDEN)
    noise = jax.random.normal(k_n, (B, ACTION_DIM), jnp.float32)  # rsample noise

    (det_action, action, log_prob), net_state = tanh_actor_forward(x, params, noise)
    jax.block_until_ready((det_action, action, log_prob))

    assert net_state is None
    assert det_action.shape == (B, ACTION_DIM)
    assert action.shape == (B, ACTION_DIM)
    assert log_prob.shape == (B,)
    assert bool(jnp.all(jnp.isfinite(det_action)))
    assert bool(jnp.all(jnp.isfinite(action)))
    assert bool(jnp.all(jnp.isfinite(log_prob)))
    assert bool(jnp.all(jnp.abs(action) <= 1.0))
    assert bool(jnp.all(jnp.abs(det_action) <= 1.0))

    # loose tolerance: kernel (Mosaic MXU) and XLA reference may use different
    # f32 matmul pass counts; this catches layout/slicing/order bugs.
    ref_det, ref_act, ref_lp = _reference_forward(x, params, noise)
    assert bool(jnp.allclose(det_action, ref_det, atol=1e-1, rtol=1e-1))
    assert bool(jnp.allclose(action, ref_act, atol=1e-1, rtol=1e-1))
    assert bool(jnp.allclose(log_prob, ref_lp, atol=1e-1, rtol=1e-1))

    print("KERNEL_OK")
</pallas_src>

<mosaic_0001>
module attributes {stable_mosaic.version = 11 : i64} {
  func.func @_tanh_actor_kernel(%arg0: i32, %arg1: memref<8x16xf32, #tpu.memory_space<vmem>>, %arg2: memref<16x256xf32, #tpu.memory_space<vmem>>, %arg3: memref<256x256xf32, #tpu.memory_space<vmem>>, %arg4: memref<256x256xf32, #tpu.memory_space<vmem>>, %arg5: memref<1x768xf32, #tpu.memory_space<vmem>>, %arg6: memref<8x128xf32, #tpu.memory_space<vmem>>, %arg7: memref<8x384xf32, #tpu.memory_space<vmem>>) attributes {dimension_semantics = [#tpu.dimension_semantics<parallel>], iteration_bounds = array<i64: 1>, scalar_prefetch = 0 : i64, scratch_operands = 0 : i64, tpu.core_type = #tpu.core_type<tc>, window_params = [{transform_indices = @transform_0, window_bounds = array<i64: 8, 16>}, {pipeline_mode = #tpu.pipeline_mode<synchronous>, transform_indices = @transform_1, window_bounds = array<i64: 16, 256>}, {pipeline_mode = #tpu.pipeline_mode<synchronous>, transform_indices = @transform_2, window_bounds = array<i64: 256, 256>}, {pipeline_mode = #tpu.pipeline_mode<synchronous>, transform_indices = @transform_3, window_bounds = array<i64: 256, 256>}, {pipeline_mode = #tpu.pipeline_mode<synchronous>, transform_indices = @transform_4, window_bounds = array<i64: 1, 768>}, {transform_indices = @transform_5, window_bounds = array<i64: 8, 128>}, {transform_indices = @transform_6, window_bounds = array<i64: 8, 384>}]} {
    %c0 = arith.constant 0 : index
    %c0_0 = arith.constant 0 : index
    %0 = vector.load %arg5[%c0, %c0_0] : memref<1x768xf32, #tpu.memory_space<vmem>>, vector<1x256xf32>
    %c0_1 = arith.constant 0 : index
    %c256 = arith.constant 256 : index
    %1 = vector.load %arg5[%c0_1, %c256] : memref<1x768xf32, #tpu.memory_space<vmem>>, vector<1x256xf32>
    %c0_2 = arith.constant 0 : index
    %c512 = arith.constant 512 : index
    %2 = vector.load %arg5[%c0_2, %c512] : memref<1x768xf32, #tpu.memory_space<vmem>>, vector<1x128xf32>
    %c0_3 = arith.constant 0 : index
    %c640 = arith.constant 640 : index
    %3 = vector.load %arg5[%c0_3, %c640] : memref<1x768xf32, #tpu.memory_space<vmem>>, vector<1x128xf32>
    %c0_4 = arith.constant 0 : index
    %c0_5 = arith.constant 0 : index
    %4 = vector.load %arg1[%c0_4, %c0_5] : memref<8x16xf32, #tpu.memory_space<vmem>>, vector<8x16xf32>
    %c0_6 = arith.constant 0 : index
    %c0_7 = arith.constant 0 : index
    %5 = vector.load %arg2[%c0_6, %c0_7] : memref<16x256xf32, #tpu.memory_space<vmem>>, vector<16x256xf32>
    %cst = arith.constant dense<0.000000e+00> : vector<8x256xf32>
    %6 = tpu.matmul %4, %5, %cst {dimension_numbers = #tpu.dot_dimension_numbers<[1], [0], [0], [1], [0, 0, 1, 1], [], []>} : vector<8x16xf32>, vector<16x256xf32>, vector<8x256xf32> -> vector<8x256xf32>
    %7 = vector.broadcast %0 : vector<1x256xf32> to vector<8x256xf32>
    %8 = arith.addf %6, %7 : vector<8x256xf32>
    %cst_8 = arith.constant 0.000000e+00 : f32
    %9 = vector.broadcast %cst_8 : f32 to vector<8x256xf32>
    %10 = arith.maximumf %8, %9 : vector<8x256xf32>
    %c0_9 = arith.constant 0 : index
    %c0_10 = arith.constant 0 : index
    %11 = vector.load %arg3[%c0_9, %c0_10] : memref<256x256xf32, #tpu.memory_space<vmem>>, vector<256x256xf32>
    %cst_11 = arith.constant dense<0.000000e+00> : vector<8x256xf32>
    %12 = tpu.matmul %10, %11, %cst_11 {dimension_numbers = #tpu.dot_dimension_numbers<[1], [0], [0], [1], [0, 0, 1, 1], [], []>} : vector<8x256xf32>, vector<256x256xf32>, vector<8x256xf32> -> vector<8x256xf32>
    %13 = vector.broadcast %1 : vector<1x256xf32> to vector<8x256xf32>
    %14 = arith.addf %12, %13 : vector<8x256xf32>
    %cst_12 = arith.constant 0.000000e+00 : f32
    %15 = vector.broadcast %cst_12 : f32 to vector<8x256xf32>
    %16 = arith.maximumf %14, %15 : vector<8x256xf32>
    %c0_13 = arith.constant 0 : index
    %c0_14 = arith.constant 0 : index
    %17 = vector.load %arg4[%c0_13, %c0_14] : memref<256x256xf32, #tpu.memory_space<vmem>>, vector<256x256xf32>
    %cst_15 = arith.constant dense<0.000000e+00> : vector<8x256xf32>
    %18 = tpu.matmul %16, %17, %cst_15 {dimension_numbers = #tpu.dot_dimension_numbers<[1], [0], [0], [1], [0, 0, 1, 1], [], []>} : vector<8x256xf32>, vector<256x256xf32>, vector<8x256xf32> -> vector<8x256xf32>
    %19 = vector.extract_strided_slice %18 {offsets = [0, 0], sizes = [8, 128], strides = [1, 1]} : vector<8x256xf32> to vector<8x128xf32>
    %20 = vector.broadcast %2 : vector<1x128xf32> to vector<8x128xf32>
    %21 = arith.addf %19, %20 : vector<8x128xf32>
    %cst_16 = arith.constant -7.000000e+00 : f32
    %cst_17 = arith.constant 7.000000e+00 : f32
    %22 = vector.broadcast %cst_16 : f32 to vector<8x128xf32>
    %23 = arith.maximumf %22, %21 : vector<8x128xf32>
    %24 = vector.broadcast %cst_17 : f32 to vector<8x128xf32>
    %25 = arith.minimumf %24, %23 : vector<8x128xf32>
    %26 = vector.extract_strided_slice %18 {offsets = [0, 128], sizes = [8, 128], strides = [1, 1]} : vector<8x256xf32> to vector<8x128xf32>
    %27 = vector.broadcast %3 : vector<1x128xf32> to vector<8x128xf32>
    %28 = arith.addf %26, %27 : vector<8x128xf32>
    %cst_18 = arith.constant -5.000000e+00 : f32
    %cst_19 = arith.constant 2.000000e+00 : f32
    %29 = vector.broadcast %cst_18 : f32 to vector<8x128xf32>
    %30 = arith.maximumf %29, %28 : vector<8x128xf32>
    %31 = vector.broadcast %cst_19 : f32 to vector<8x128xf32>
    %32 = arith.minimumf %31, %30 : vector<8x128xf32>
    %33 = math.exp %32 : vector<8x128xf32>
    %cst_20 = arith.constant 1.000000e+00 : f32
    %34 = vector.broadcast %cst_20 : f32 to vector<8x128xf32>
    %35 = arith.mulf %33, %34 : vector<8x128xf32>
    %c0_21 = arith.constant 0 : index
    %c0_22 = arith.constant 0 : index
    %36 = vector.load %arg6[%c0_21, %c0_22] : memref<8x128xf32, #tpu.memory_space<vmem>>, vector<8x128xf32>
    %37 = arith.mulf %35, %36 : vector<8x128xf32>
    %38 = arith.addf %25, %37 : vector<8x128xf32>
    %39 = math.tanh %38 : vector<8x128xf32>
    %40 = math.tanh %25 : vector<8x128xf32>
    %41 = tpu.iota {dimensions = array<i32: 1>} : vector<1x128xi32>
    %c4_i32 = arith.constant 4 : i32
    %42 = vector.broadcast %c4_i32 : i32 to vector<1x128xi32>
    %43 = arith.cmpi slt, %41, %42 : vector<1x128xi32>
    %44 = arith.extui %43 : vector<1x128xi1> to vector<1x128xi32>
    %45 = arith.sitofp %44 : vector<1x128xi32> to vector<1x128xf32>
    %cst_23 = arith.constant -5.000000e-01 : f32
    %46 = vector.broadcast %cst_23 : f32 to vector<8x128xf32>
    %47 = arith.mulf %46, %36 : vector<8x128xf32>
    %48 = arith.mulf %47, %36 : vector<8x128xf32>
    %49 = arith.subf %48, %32 : vector<8x128xf32>
    %50 = vector.broadcast %45 : vector<1x128xf32> to vector<8x128xf32>
    %51 = arith.mulf %49, %50 : vector<8x128xf32>
    %cst_24 = arith.constant dense<0.000000e+00> : vector<8xf32>
    %52 = vector.multi_reduction <add>, %51, %cst_24 [1] : vector<8x128xf32> to vector<8xf32>
    %53 = vector.shape_cast %52 : vector<8xf32> to vector<8x1xf32>
    %cst_25 = arith.constant 3.67575407 : f32
    %54 = vector.broadcast %cst_25 : f32 to vector<8x1xf32>
    %55 = arith.subf %53, %54 : vector<8x1xf32>
    %56 = arith.mulf %39, %39 : vector<8x128xf32>
    %cst_26 = arith.constant 1.000000e+00 : f32
    %57 = vector.broadcast %cst_26 : f32 to vector<8x128xf32>
    %58 = arith.subf %57, %56 : vector<8x128xf32>
    %cst_27 = arith.constant 9.99999997E-7 : f32
    %59 = vector.broadcast %cst_27 : f32 to vector<8x128xf32>
    %60 = arith.addf %58, %59 : vector<8x128xf32>
    %61 = math.log %60 : vector<8x128xf32>
    %62 = vector.broadcast %45 : vector<1x128xf32> to vector<8x128xf32>
    %63 = arith.mulf %61, %62 : vector<8x128xf32>
    %cst_28 = arith.constant dense<0.000000e+00> : vector<8xf32>
    %64 = vector.multi_reduction <add>, %63, %cst_28 [1] : vector<8x128xf32> to vector<8xf32>
    %65 = vector.shape_cast %64 : vector<8xf32> to vector<8x1xf32>
    %66 = arith.subf %55, %65 : vector<8x1xf32>
    %c0_29 = arith.constant 0 : index
    %c0_30 = arith.constant 0 : index
    %67 = vector.load %arg7[%c0_29, %c0_30] : memref<8x384xf32, #tpu.memory_space<vmem>>, vector<8x128xf32>
    tpu.vector_store %arg7[%c0_29, %c0_30], %40 {strides = array<i32>} : memref<8x384xf32, #tpu.memory_space<vmem>>, vector<8x128xf32>,
    %c0_31 = arith.constant 0 : index
    %c128 = arith.constant 128 : index
    %68 = vector.load %arg7[%c0_31, %c128] : memref<8x384xf32, #tpu.memory_space<vmem>>, vector<8x128xf32>
    tpu.vector_store %arg7[%c0_31, %c128], %39 {strides = array<i32>} : memref<8x384xf32, #tpu.memory_space<vmem>>, vector<8x128xf32>,
    %69 = vector.shape_cast %66 : vector<8x1xf32> to vector<8x1xf32>
    %70 = vector.broadcast %69 : vector<8x1xf32> to vector<8x128xf32>
    %c0_32 = arith.constant 0 : index
    %c256_33 = arith.constant 256 : index
    %71 = vector.load %arg7[%c0_32, %c256_33] : memref<8x384xf32, #tpu.memory_space<vmem>>, vector<8x128xf32>
    tpu.vector_store %arg7[%c0_32, %c256_33], %70 {strides = array<i32>} : memref<8x384xf32, #tpu.memory_space<vmem>>, vector<8x128xf32>,
    return
  }
  func.func @transform_0(%arg0: i32) -> (i32, i32) {
    %c0_i32 = arith.constant 0 : i32
    %c0_i32_0 = arith.constant 0 : i32
    return %arg0, %c0_i32 : i32, i32
  }
  func.func @transform_1(%arg0: i32) -> (i32, i32) {
    %c0_i32 = arith.constant 0 : i32
    %c0_i32_0 = arith.constant 0 : i32
    %c0_i32_1 = arith.constant 0 : i32
    return %c0_i32, %c0_i32_0 : i32, i32
  }
  func.func @transform_2(%arg0: i32) -> (i32, i32) {
    %c0_i32 = arith.constant 0 : i32
    %c0_i32_0 = arith.constant 0 : i32
    %c0_i32_1 = arith.constant 0 : i32
    return %c0_i32, %c0_i32_0 : i32, i32
  }
  func.func @transform_3(%arg0: i32) -> (i32, i32) {
    %c0_i32 = arith.constant 0 : i32
    %c0_i32_0 = arith.constant 0 : i32
    %c0_i32_1 = arith.constant 0 : i32
    return %c0_i32, %c0_i32_0 : i32, i32
  }
  func.func @transform_4(%arg0: i32) -> (i32, i32) {
    %c0_i32 = arith.constant 0 : i32
    %c0_i32_0 = arith.constant 0 : i32
    %c0_i32_1 = arith.constant 0 : i32
    return %c0_i32, %c0_i32_0 : i32, i32
  }
  func.func @transform_5(%arg0: i32) -> (i32, i32) {
    %c0_i32 = arith.constant 0 : i32
    %c0_i32_0 = arith.constant 0 : i32
    return %arg0, %c0_i32 : i32, i32
  }
  func.func @transform_6(%arg0: i32) -> (i32, i32) {
    %c0_i32 = arith.constant 0 : i32
    %c0_i32_0 = arith.constant 0 : i32
    return %arg0, %c0_i32 : i32, i32
  }
}

</mosaic_0001>

<bundles_post_ra>
// kernel: tpu_custom_call.1
= control target key start
LH: loop header
LB: loop body
LE: loop exit
PB: predicated region body
PF: predicated region fallthrough
CT: control target
= control target key end

     0   :  { %11 = vsyncpa [#allocation3], 0  ;;  %s924_s0 = inlined_call_operand.hbm [shape: f32[8,16], index: 0, kind: input, shape index: {}]   ;;  %s925_s1 = inlined_call_operand.hbm [shape: f32[16,256], index: 1, kind: input, shape index: {}]   ;;  %s926_s2 = inlined_call_operand.hbm [shape: f32[256,256], index: 2, kind: input, shape index: {}]   ;;  %s927_s3 = inlined_call_operand.hbm [shape: f32[256,256], index: 3, kind: input, shape index: {}]   ;;  %s928_s4 = inlined_call_operand.vmem [shape: f32[1,768], index: 4, kind: input, shape index: {}]   ;;  %s929_s5 = inlined_call_operand.vmem [shape: f32[8,128], index: 5, kind: input, shape index: {}]   ;;  %s930_s6 = inlined_call_operand.hbm [shape: f32[8,384], index: 6, kind: output, shape index: {}]  }
   0x1   :  { %12 = vsyncpa [#allocation6], 0 }
   0x2   :  { %13 = vsyncpa [#allocation9], 0 }
   0x3   :  { %14 = vsyncpa [#allocation4], 0  ;;  %s795_s21 = smov [#allocation5]   ;;  %s677_s25 = scalar_lea.hbm %s925_s1, 512 }
   0x4   :  { %s30_s22 = sshll.u32 %s795_s21, 4  ;;  %p678_p0 = scmp.ne.s32.totalorder %s925_s1, %s677_s25  ;;  %s31_s22 = int_to_ptr.vmem [resolvable:$true] %s30_s22 }
   0x5   :  { %p681_p1 = scmp.lt.u32.totalorder %s677_s25, %s925_s1 }
   0x7   :  { %p683_p2 = pnand %p681_p1, %p678_p0 }
   0x9   :  { %686 = shalt.err (!%p683_p2)
}
   0xa   :  { %s687_s30 = scalar_lea.vmem %s31_s22, 512  ;;  %p692_p4 = scmp.lt.s32.totalorder %s31_s22, %s31_s22 }
   0xb   :  { %p688_p3 = scmp.ne.s32.totalorder %s31_s22, %s687_s30  ;;  %p693_p5 = scmp.lt.s32.totalorder %s687_s30, %s687_s30 }
   0xd   :  { %p694_p6 = por %p693_p5, %p692_p4 }
   0xf   :  { %p695_p7 = pnand %p694_p6, %p688_p3 }
  0x11   :  { %698 = shalt.err (!%p695_p7)
}
  0x12   :  { %s796_s7 = smov 256   ;;  %s797_s8 = smov 16  }
  0x13   :  { %36 = dma.hbm_to_vmem [thread:$0]  %s925_s1, 512, %s31_s22, [#allocation6], %s796_s7, %s796_s7, %s797_s8  }
  0x14   :  { %s798_s11 = smov [#allocation2]   ;;  %s799_s13 = smov [#allocation7]  }
  0x15   :  { %s21_s12 = sshll.u32 %s798_s11, 4  ;;  %s42_s14 = sshll.u32 %s799_s13, 4  ;;  %s22_s12 = int_to_ptr.vmem [resolvable:$true] %s21_s12  ;;  %s43_s14 = int_to_ptr.vmem [resolvable:$true] %s42_s14 }
  0x16   :  { %s699_s17 = scalar_lea.hbm %s924_s0, 128 }
  0x17   :  { %p700_p8 = scmp.ne.s32.totalorder %s924_s0, %s699_s17  ;;  %p703_p9 = scmp.lt.u32.totalorder %s699_s17, %s924_s0 }
  0x19   :  { %p705_p10 = pnand %p703_p9, %p700_p8 }
  0x1b   :  { %708 = shalt.err (!%p705_p10)
}
  0x1c   :  { %s709_s1 = scalar_lea.vmem %s22_s12, 128  ;;  %p714_p12 = scmp.lt.s32.totalorder %s22_s12, %s22_s12 }
  0x1d   :  { %p710_p11 = scmp.ne.s32.totalorder %s22_s12, %s709_s1  ;;  %p715_p13 = scmp.lt.s32.totalorder %s709_s1, %s709_s1 }
  0x1f   :  { %p716_p0 = por %p715_p13, %p714_p12 }
  0x21   :  { %p717_p1 = pnand %p716_p0, %p710_p11 }
  0x23   :  { %720 = shalt.err (!%p717_p1)
}
  0x24   :  { %24 = dma.hbm_to_vmem [thread:$0]  %s924_s0, 128, %s22_s12, [#allocation3]  }
  0x25   :  { %s721_s26 = scalar_lea.hbm %s926_s2, 8192 }
  0x26   :  { %p722_p2 = scmp.ne.s32.totalorder %s926_s2, %s721_s26  ;;  %p725_p3 = scmp.lt.u32.totalorder %s721_s26, %s926_s2 }
  0x28   :  { %p727_p4 = pnand %p725_p3, %p722_p2 }
  0x2a   :  { %730 = shalt.err (!%p727_p4)
}
  0x2b   :  { %s731_s9 = scalar_lea.vmem %s43_s14, 8192  ;;  %p736_p6 = scmp.lt.s32.totalorder %s43_s14, %s43_s14 }
  0x2c   :  { %p732_p5 = scmp.ne.s32.totalorder %s43_s14, %s731_s9  ;;  %p737_p7 = scmp.lt.s32.totalorder %s731_s9, %s731_s9 }
  0x2e   :  { %p738_p8 = por %p737_p7, %p736_p6 }
  0x30   :  { %p739_p9 = pnand %p738_p8, %p732_p5 }
  0x32   :  { %742 = shalt.err (!%p739_p9)
}
  0x33   :  { %48 = dma.hbm_to_vmem [thread:$0]  %s926_s2, 8192, %s43_s14, [#allocation6], %s796_s7, %s796_s7, %s797_s8  }
  0x34   :  { %s800_s11 = smov [#allocation8]   ;;  %s743_s16 = scalar_lea.hbm %s927_s3, 8192 }
  0x35   :  { %s54_s12 = sshll.u32 %s800_s11, 4  ;;  %p744_p10 = scmp.ne.s32.totalorder %s927_s3, %s743_s16  ;;  %s55_s12 = int_to_ptr.vmem [resolvable:$true] %s54_s12 }
  0x36   :  { %p747_p11 = scmp.lt.u32.totalorder %s743_s16, %s927_s3 }
  0x38   :  { %p749_p12 = pnand %p747_p11, %p744_p10 }
  0x3a   :  { %752 = shalt.err (!%p749_p12)
}
  0x3b   :  { %s753_s21 = scalar_lea.vmem %s55_s12, 8192  ;;  %p758_p0 = scmp.lt.s32.totalorder %s55_s12, %s55_s12 }
  0x3c   :  { %p754_p13 = scmp.ne.s32.totalorder %s55_s12, %s753_s21  ;;  %p759_p1 = scmp.lt.s32.totalorder %s753_s21, %s753_s21 }
  0x3e   :  { %p760_p2 = por %p759_p1, %p758_p0 }
  0x40   :  { %p761_p3 = pnand %p760_p2, %p754_p13 }
  0x42   :  { %764 = shalt.err (!%p761_p3)
}
  0x43   :  { %60 = dma.hbm_to_vmem [thread:$0]  %s927_s3, 8192, %s55_s12, [#allocation9], %s796_s7, %s796_s7, %s797_s8  }
  0x44   :  { %787 = dma.done.wait [#allocation3], 128  }
  0x45   :  { %788 = vsyncadd [#allocation3], 4294967168 }
  0x46   :  { %789 = dma.done.wait [#allocation6], 8704  }
  0x47   :  { %790 = vsyncadd [#allocation6], 4294958592 }
  0x48   :  { %791 = dma.done.wait [#allocation9], 8192  }
  0x49   :  { %792 = vsyncadd [#allocation9], 4294959104  ;;  %v801_v0 = vmov 0.0   ;;  %v83_v1 = vld [vmem:[#allocation5 + $0x8] sm:$0xff]  ;;  %v85_v2 = vld [vmem:[#allocation5 + $0x18] sm:$0xff]  ;;  %vm97_vm0 = vcmask 130048  }
  0x4a   :  { %165 = vmatprep.mubr.f32.mxu0 %v801_v0  ;;  %v82_v3 = vld [vmem:[#allocation5] sm:$0xff]  ;;  %v529_v4 = vpack.c.bf16 %v85_v2, %v83_v1  ;;  %v84_v5 = vld [vmem:[#allocation5 + $0x10] sm:$0xff]  ;;  %v175_v6 = vld [vmem:[#allocation7 + $0x8] sm:$0xff] }
  0x4b   :  { %v531_v7 = vpack.c.bf16 %v84_v5, %v82_v3  ;;  %v81_v8 = vld [vmem:[#allocation2] sm:$0xff]  ;;  %v174_v10 = vld [vmem:[#allocation7] sm:$0xff]  ;;  %v176_v11 = vld [vmem:[#allocation7 + $0x10] sm:$0xff] }
  0x4c   :  { %v177_v9 = vld [vmem:[#allocation7 + $0x18] sm:$0xff]  ;;  %530 = vmatprep.subr.bf16.mxu0 %v529_v4  ;;  %v535_v13 = vpack.c.bf16 %v176_v11, %v174_v10  ;;  %v179_v14 = vld [vmem:[#allocation7 + $0x28] sm:$0xff]  ;;  %v178_v16 = vld [vmem:[#allocation7 + $0x20] sm:$0xff] }
  0x4d   :  { %v533_v12 = vpack.c.bf16 %v177_v9, %v175_v6  ;;  %v181_v15 = vld [vmem:[#allocation7 + $0x38] sm:$0xff]  ;;  %532 = vmatpush1.bf16.msra.mxu0 %v531_v7  ;;  %v180_v18 = vld [vmem:[#allocation7 + $0x30] sm:$0xff]  ;;  %v183_v19 = vld [vmem:[#allocation7 + $0x48] sm:$0xff] }
  0x4e   :  { %v537_v17 = vpack.c.bf16 %v181_v15, %v179_v14  ;;  %v185_v20 = vld [vmem:[#allocation7 + $0x58] sm:$0xff]  ;;  %v539_v21 = vpack.c.bf16 %v180_v18, %v178_v16  ;;  %v182_v23 = vld [vmem:[#allocation7 + $0x40] sm:$0xff]  ;;  %v184_v24 = vld [vmem:[#allocation7 + $0x50] sm:$0xff] }
  0x4f   :  { %534 = vmatprep.subr.bf16.mxu1 %v533_v12  ;;  %v541_v22 = vpack.c.bf16 %v185_v20, %v183_v19  ;;  %v187_v25 = vld [vmem:[#allocation7 + $0x68] sm:$0xff]  ;;  %v189_v26 = vld [vmem:[#allocation7 + $0x78] sm:$0xff]  ;;  %v543_v27 = vpack.c.bf16 %v184_v24, %v182_v23  ;;  %v186_v29 = vld [vmem:[#allocation7 + $0x60] sm:$0xff] }
  0x50   :  { %536 = vmatpush1.bf16.msra.mxu1 %v535_v13  ;;  %523 = vmatmul.mubr.msk.f32.vlgmr.msra.gmra.mrb[0].mxu0 %vm97_vm0, %v81_v8  ;;  %v545_v28 = vpack.c.bf16 %v189_v26, %v187_v25  ;;  %v188_v30 = vld [vmem:[#allocation7 + $0x70] sm:$0xff]  ;;  %v191_v31 = vld [vmem:[#allocation7 + $0x88] sm:$0xff]  ;;  %v193_v32 = vld [vmem:[#allocation7 + $0x98] sm:$0xff] }
  0x51   :  { %538 = vmatprep.subr.bf16.mxu1 %v537_v17  ;;  %v547_v33 = vpack.c.bf16 %v188_v30, %v186_v29  ;;  %v549_v34 = vpack.c.bf16 %v193_v32, %v191_v31  ;;  %v190_v35 = vld [vmem:[#allocation7 + $0x80] sm:$0xff]  ;;  %v192_v36 = vld [vmem:[#allocation7 + $0x90] sm:$0xff]  ;;  %v195_v37 = vld [vmem:[#allocation7 + $0xa8] sm:$0xff] }
  0x52   :  { %v197_v38 = vld [vmem:[#allocation7 + $0xb8] sm:$0xff]  ;;  %v551_v39 = vpack.c.bf16 %v192_v36, %v190_v35  ;;  %v194_v41 = vld [vmem:[#allocation7 + $0xa0] sm:$0xff]  ;;  %v196_v42 = vld [vmem:[#allocation7 + $0xb0] sm:$0xff] }
  0x53   :  { %v553_v40 = vpack.c.bf16 %v197_v38, %v195_v37  ;;  %v199_v43 = vld [vmem:[#allocation7 + $0xc8] sm:$0xff]  ;;  %v201_v44 = vld [vmem:[#allocation7 + $0xd8] sm:$0xff]  ;;  %v555_v45 = vpack.c.bf16 %v196_v42, %v194_v41  ;;  %v198_v47 = vld [vmem:[#allocation7 + $0xc0] sm:$0xff] }
  0x54   :  { %540 = vmatpush1.bf16.msra.mxu1 %v539_v21  ;;  %v557_v46 = vpack.c.bf16 %v201_v44, %v199_v43  ;;  %v200_v48 = vld [vmem:[#allocation7 + $0xd0] sm:$0xff]  ;;  %v203_v49 = vld [vmem:[#allocation7 + $0xe8] sm:$0xff]  ;;  %v205_v50 = vld [vmem:[#allocation7 + $0xf8] sm:$0xff] }
  0x55   :  { %542 = vmatprep.subr.bf16.mxu1 %v541_v22  ;;  %v559_v51 = vpack.c.bf16 %v200_v48, %v198_v47  ;;  %v561_v52 = vpack.c.bf16 %v205_v50, %v203_v49  ;;  %v202_v53 = vld [vmem:[#allocation7 + $0xe0] sm:$0xff]  ;;  %v204_v54 = vld [vmem:[#allocation7 + $0xf0] sm:$0xff]  ;;  %v207_v55 = vld [vmem:[#allocation7 + $0x108] sm:$0xff] }
  0x56   :  { %v209_v56 = vld [vmem:[#allocation7 + $0x118] sm:$0xff]  ;;  %v563_v57 = vpack.c.bf16 %v204_v54, %v202_v53  ;;  %v206_v59 = vld [vmem:[#allocation7 + $0x100] sm:$0xff]  ;;  %v208_v60 = vld [vmem:[#allocation7 + $0x110] sm:$0xff] }
  0x57   :  { %v565_v58 = vpack.c.bf16 %v209_v56, %v207_v55  ;;  %v211_v61 = vld [vmem:[#allocation7 + $0x128] sm:$0xff]  ;;  %v213_v62 = vld [vmem:[#allocation7 + $0x138] sm:$0xff]  ;;  %v567_v63 = vpack.c.bf16 %v208_v60, %v206_v59  ;;  %v210_v2 = vld [vmem:[#allocation7 + $0x120] sm:$0xff] }
  0x58   :  { %544 = vmatpush1.bf16.msra.mxu1 %v543_v27  ;;  %v569_v1 = vpack.c.bf16 %v213_v62, %v211_v61  ;;  %v212_v3 = vld [vmem:[#allocation7 + $0x130] sm:$0xff]  ;;  %v215_v4 = vld [vmem:[#allocation7 + $0x148] sm:$0xff]  ;;  %v217_v5 = vld [vmem:[#allocation7 + $0x158] sm:$0xff] }
  0x59   :  { %546 = vmatprep.subr.bf16.mxu1 %v545_v28  ;;  %v571_v6 = vpack.c.bf16 %v212_v3, %v210_v2  ;;  %v573_v7 = vpack.c.bf16 %v217_v5, %v215_v4  ;;  %v214_v8 = vld [vmem:[#allocation7 + $0x140] sm:$0xff]  ;;  %v216_v9 = vld [vmem:[#allocation7 + $0x150] sm:$0xff]  ;;  %v219_v10 = vld [vmem:[#allocation7 + $0x168] sm:$0xff] }
  0x5a   :  { %v221_v11 = vld [vmem:[#allocation7 + $0x178] sm:$0xff]  ;;  %v575_v12 = vpack.c.bf16 %v216_v9, %v214_v8  ;;  %v218_v14 = vld [vmem:[#allocation7 + $0x160] sm:$0xff]  ;;  %v220_v15 = vld [vmem:[#allocation7 + $0x170] sm:$0xff] }
  0x5b   :  { %v577_v13 = vpack.c.bf16 %v221_v11, %v219_v10  ;;  %v223_v16 = vld [vmem:[#allocation7 + $0x188] sm:$0xff]  ;;  %v225_v17 = vld [vmem:[#allocation7 + $0x198] sm:$0xff]  ;;  %v579_v18 = vpack.c.bf16 %v220_v15, %v218_v14  ;;  %v222_v20 = vld [vmem:[#allocation7 + $0x180] sm:$0xff] }
  0x5c   :  { %548 = vmatpush1.bf16.msra.mxu1 %v547_v33  ;;  %v581_v19 = vpack.c.bf16 %v225_v17, %v223_v16  ;;  %v224_v21 = vld [vmem:[#allocation7 + $0x190] sm:$0xff]  ;;  %v227_v22 = vld [vmem:[#allocation7 + $0x1a8] sm:$0xff]  ;;  %v229_v23 = vld [vmem:[#allocation7 + $0x1b8] sm:$0xff] }
  0x5d   :  { %550 = vmatprep.subr.bf16.mxu1 %v549_v34  ;;  %v583_v24 = vpack.c.bf16 %v224_v21, %v222_v20  ;;  %v585_v25 = vpack.c.bf16 %v229_v23, %v227_v22  ;;  %v226_v26 = vld [vmem:[#allocation7 + $0x1a0] sm:$0xff]  ;;  %v228_v27 = vld [vmem:[#allocation7 + $0x1b0] sm:$0xff]  ;;  %v231_v28 = vld [vmem:[#allocation7 + $0x1c8] sm:$0xff] }
  0x5e   :  { %v233_v29 = vld [vmem:[#allocation7 + $0x1d8] sm:$0xff]  ;;  %v587_v30 = vpack.c.bf16 %v228_v27, %v226_v26  ;;  %v230_v32 = vld [vmem:[#allocation7 + $0x1c0] sm:$0xff]  ;;  %v232_v33 = vld [vmem:[#allocation7 + $0x1d0] sm:$0xff] }
  0x5f   :  { %v589_v31 = vpack.c.bf16 %v233_v29, %v231_v28  ;;  %v591_v34 = vpack.c.bf16 %v232_v33, %v230_v32  ;;  %v235_v35 = vld [vmem:[#allocation7 + $0x1e8] sm:$0xff]  ;;  %v237_v36 = vld [vmem:[#allocation7 + $0x1f8] sm:$0xff]  ;;  %v234_v38 = vld [vmem:[#allocation7 + $0x1e0] sm:$0xff] }
  0x60   :  { %552 = vmatpush1.bf16.msra.mxu1 %v551_v39  ;;  %v593_v37 = vpack.c.bf16 %v237_v36, %v235_v35  ;;  %v236_v39 = vld [vmem:[#allocation7 + $0x1f0] sm:$0xff]  ;;  %v323_v41 = vld [vmem:[#allocation8 + $0x8] sm:$0xff]  ;;  %v325_v42 = vld [vmem:[#allocation8 + $0x18] sm:$0xff] }
  0x61   :  { %554 = vmatprep.subr.bf16.mxu1 %v553_v40  ;;  %v595_v40 = vpack.c.bf16 %v236_v39, %v234_v38  ;;  %v322_v43 = vld [vmem:[#allocation8] sm:$0xff]  ;;  %v597_v44 = vpack.c.bf16 %v325_v42, %v323_v41  ;;  %v329_v47 = vld [vmem:[#allocation8 + $0x38] sm:$0xff]  ;;  %v360_v36 = vld [vmem:[#allocation8 + $0x130] sm:$0xff] }
  0x62   :  { %v326_v50 = vld [vmem:[#allocation8 + $0x20] sm:$0xff]  ;;  %v333_v53 = vld [vmem:[#allocation8 + $0x58] sm:$0xff]  ;;  %v364_v42 = vld [vmem:[#allocation8 + $0x150] sm:$0xff] }
  0x63   :  { %598 = vmatprep.subr.bf16.mxu0 %v597_v44  ;;  %v330_v56 = vld [vmem:[#allocation8 + $0x40] sm:$0xff]  ;;  %v337_v59 = vld [vmem:[#allocation8 + $0x78] sm:$0xff] }
  0x64   :  { %556 = vmatpush1.bf16.msra.mxu1 %v555_v45  ;;  %v324_v45 = vld [vmem:[#allocation8 + $0x10] sm:$0xff]  ;;  %v334_v62 = vld [vmem:[#allocation8 + $0x60] sm:$0xff]  ;;  %v341_v2 = vld [vmem:[#allocation8 + $0x98] sm:$0xff] }
  0x65   :  { %558 = vmatprep.subr.bf16.mxu1 %v557_v46  ;;  %v327_v46 = vld [vmem:[#allocation8 + $0x28] sm:$0xff]  ;;  %v599_v48 = vpack.c.bf16 %v324_v45, %v322_v43  ;;  %v338_v5 = vld [vmem:[#allocation8 + $0x80] sm:$0xff]  ;;  %v345_v8 = vld [vmem:[#allocation8 + $0xb8] sm:$0xff] }
  0x66   :  { %v601_v49 = vpack.c.bf16 %v329_v47, %v327_v46  ;;  %v342_v11 = vld [vmem:[#allocation8 + $0xa0] sm:$0xff]  ;;  %v349_v14 = vld [vmem:[#allocation8 + $0xd8] sm:$0xff]  ;;  %v367_v43 = vld [vmem:[#allocation8 + $0x168] sm:$0xff] }
  0x67   :  { %600 = vmatpush1.bf16.msra.mxu0 %v599_v48  ;;  %v346_v17 = vld [vmem:[#allocation8 + $0xc0] sm:$0xff]  ;;  %v353_v20 = vld [vmem:[#allocation8 + $0xf8] sm:$0xff]  ;;  %v368_v48 = vld [vmem:[#allocation8 + $0x170] sm:$0xff] }
  0x68   :  { %560 = vmatpush1.bf16.msra.mxu1 %v559_v51  ;;  %v328_v51 = vld [vmem:[#allocation8 + $0x30] sm:$0xff]  ;;  %602 = vmatprep.subr.bf16.mxu0 %v601_v49  ;;  %v350_v23 = vld [vmem:[#allocation8 + $0xe0] sm:$0xff]  ;;  %v357_v26 = vld [vmem:[#allocation8 + $0x118] sm:$0xff] }
  0x69   :  { %562 = vmatprep.subr.bf16.mxu1 %v561_v52  ;;  %v331_v52 = vld [vmem:[#allocation8 + $0x48] sm:$0xff]  ;;  %v603_v54 = vpack.c.bf16 %v328_v51, %v326_v50  ;;  %v354_v29 = vld [vmem:[#allocation8 + $0x100] sm:$0xff]  ;;  %v361_v32 = vld [vmem:[#allocation8 + $0x138] sm:$0xff] }
  0x6a   :  { %v605_v55 = vpack.c.bf16 %v333_v53, %v331_v52  ;;  %v358_v35 = vld [vmem:[#allocation8 + $0x120] sm:$0xff]  ;;  %v365_v38 = vld [vmem:[#allocation8 + $0x158] sm:$0xff]  ;;  %v371_v49 = vld [vmem:[#allocation8 + $0x188] sm:$0xff] }
  0x6b   :  { %604 = vmatpush1.bf16.msra.mxu0 %v603_v54  ;;  %v635_v39 = vpack.c.bf16 %v360_v36, %v358_v35  ;;  %v362_v41 = vld [vmem:[#allocation8 + $0x140] sm:$0xff]  ;;  %v369_v44 = vld [vmem:[#allocation8 + $0x178] sm:$0xff]  ;;  %v372_v54 = vld [vmem:[#allocation8 + $0x190] sm:$0xff] }
  0x6c   :  { %564 = vmatpush1.bf16.msra.mxu1 %v563_v57  ;;  %v332_v57 = vld [vmem:[#allocation8 + $0x50] sm:$0xff]  ;;  %606 = vmatprep.subr.bf16.mxu0 %v605_v55  ;;  %v639_v45 = vpack.c.bf16 %v364_v42, %v362_v41  ;;  %v641_v46 = vpack.c.bf16 %v369_v44, %v367_v43  ;;  %v366_v47 = vld [vmem:[#allocation8 + $0x160] sm:$0xff]  ;;  %v373_v50 = vld [vmem:[#allocation8 + $0x198] sm:$0xff] }
  0x6d   :  { %566 = vmatprep.subr.bf16.mxu1 %v565_v58  ;;  %v335_v58 = vld [vmem:[#allocation8 + $0x68] sm:$0xff]  ;;  %v607_v60 = vpack.c.bf16 %v332_v57, %v330_v56  ;;  %v643_v51 = vpack.c.bf16 %v368_v48, %v366_v47  ;;  %v645_v52 = vpack.c.bf16 %v373_v50, %v371_v49  ;;  %v370_v53 = vld [vmem:[#allocation8 + $0x180] sm:$0xff]  ;;  %v377_v56 = vld [vmem:[#allocation8 + $0x1b8] sm:$0xff] }
  0x6e   :  { %v609_v61 = vpack.c.bf16 %v337_v59, %v335_v58  ;;  %v375_v55 = vld [vmem:[#allocation8 + $0x1a8] sm:$0xff]  ;;  %v647_v57 = vpack.c.bf16 %v372_v54, %v370_v53  ;;  %v374_v59 = vld [vmem:[#allocation8 + $0x1a0] sm:$0xff]  ;;  %v526_v35 = vld [vmem:[%s928_s4 + $0x5] ss:$0 sm:$0xff] }
  0x6f   :  { %608 = vmatpush1.bf16.msra.mxu0 %v607_v60  ;;  %v649_v58 = vpack.c.bf16 %v377_v56, %v375_v55  ;;  %v376_v60 = vld [vmem:[#allocation8 + $0x1b0] sm:$0xff] }
  0x70   :  { %568 = vmatpush1.bf16.msra.mxu1 %v567_v63  ;;  %v336_v63 = vld [vmem:[#allocation8 + $0x70] sm:$0xff]  ;;  %610 = vmatprep.subr.bf16.mxu0 %v609_v61  ;;  %v379_v61 = vld [vmem:[#allocation8 + $0x1c8] sm:$0xff] }
  0x71   :  { %570 = vmatprep.subr.bf16.mxu1 %v569_v1  ;;  %v339_v1 = vld [vmem:[#allocation8 + $0x88] sm:$0xff]  ;;  %v611_v3 = vpack.c.bf16 %v336_v63, %v334_v62  ;;  %v381_v62 = vld [vmem:[#allocation8 + $0x1d8] sm:$0xff]  ;;  %v651_v63 = vpack.c.bf16 %v376_v60, %v374_v59 }
  0x72   :  { %v613_v4 = vpack.c.bf16 %v341_v2, %v339_v1  ;;  %v653_v1 = vpack.c.bf16 %v381_v62, %v379_v61  ;;  %v87_v2 = vlaneseq }
  0x73   :  { %612 = vmatpush1.bf16.msra.mxu0 %v611_v3 }
  0x74   :  { %572 = vmatpush1.bf16.msra.mxu1 %v571_v6  ;;  %v340_v6 = vld [vmem:[#allocation8 + $0x90] sm:$0xff]  ;;  %614 = vmatprep.subr.bf16.mxu0 %v613_v4  ;;  %v88_v3 = vshrl.u32 %v87_v2, 7 }
  0x75   :  { %574 = vmatprep.subr.bf16.mxu1 %v573_v7  ;;  %v343_v7 = vld [vmem:[#allocation8 + $0xa8] sm:$0xff]  ;;  %v615_v9 = vpack.c.bf16 %v340_v6, %v338_v5  ;;  %v77_v5 = vld [vmem:[%s928_s4] sm:$0x3] }
  0x76   :  { %v617_v10 = vpack.c.bf16 %v345_v8, %v343_v7  ;;  %v89_v4 = vsub.s32 0, %v88_v3  ;;  %v93_v6 = vsub.s32 1, %v88_v3 }
  0x77   :  { %616 = vmatpush1.bf16.msra.mxu0 %v615_v9 }
  0x78   :  { %576 = vmatpush1.bf16.msra.mxu1 %v575_v12  ;;  %v344_v12 = vld [vmem:[#allocation8 + $0xb0] sm:$0xff]  ;;  %618 = vmatprep.subr.bf16.mxu0 %v617_v10  ;;  %v90_v7 = vrot.slane %v77_v5, %v89_v4  ;;  %v94_v8 = vrot.slane %v77_v5, %v93_v6 }
  0x79   :  { %578 = vmatprep.subr.bf16.mxu1 %v577_v13  ;;  %v347_v13 = vld [vmem:[#allocation8 + $0xc8] sm:$0xff]  ;;  %v619_v15 = vpack.c.bf16 %v344_v12, %v342_v11 }
  0x7a   :  { %v621_v16 = vpack.c.bf16 %v349_v14, %v347_v13 }
  0x7b   :  { %620 = vmatpush1.bf16.msra.mxu0 %v619_v15  ;;  %v378_v15 = vld [vmem:[#allocation8 + $0x1c0] sm:$0xff] }
  0x7c   :  { %580 = vmatpush1.bf16.msra.mxu1 %v579_v18  ;;  %v348_v18 = vld [vmem:[#allocation8 + $0xd0] sm:$0xff]  ;;  %622 = vmatprep.subr.bf16.mxu0 %v621_v16 }
  0x7d   :  { %582 = vmatprep.subr.bf16.mxu1 %v581_v19  ;;  %v351_v19 = vld [vmem:[#allocation8 + $0xe8] sm:$0xff]  ;;  %v623_v21 = vpack.c.bf16 %v348_v18, %v346_v17  ;;  %v380_v16 = vld [vmem:[#allocation8 + $0x1d0] sm:$0xff] }
  0x7e   :  { %v625_v22 = vpack.c.bf16 %v353_v20, %v351_v19  ;;  %v655_v17 = vpack.c.bf16 %v380_v16, %v378_v15  ;;  %v383_v18 = vld [vmem:[#allocation8 + $0x1e8] sm:$0xff]  ;;  %v385_v19 = vld [vmem:[#allocation8 + $0x1f8] sm:$0xff] }
  0x7f   :  { %624 = vmatpush1.bf16.msra.mxu0 %v623_v21  ;;  %v657_v20 = vpack.c.bf16 %v385_v19, %v383_v18  ;;  %v382_v21 = vld [vmem:[#allocation8 + $0x1e0] sm:$0xff] }
  0x80   :  { %584 = vmatpush1.bf16.msra.mxu1 %v583_v24  ;;  %v352_v24 = vld [vmem:[#allocation8 + $0xf0] sm:$0xff]  ;;  %626 = vmatprep.subr.bf16.mxu0 %v625_v22 }
  0x81   :  { %586 = vmatprep.subr.bf16.mxu1 %v585_v25  ;;  %v355_v25 = vld [vmem:[#allocation8 + $0x108] sm:$0xff]  ;;  %v627_v27 = vpack.c.bf16 %v352_v24, %v350_v23  ;;  %v384_v22 = vld [vmem:[#allocation8 + $0x1f0] sm:$0xff]  ;;  %v78_v24 = vld [vmem:[%s928_s4 + $0x2] sm:$0x3] }
  0x82   :  { %v629_v28 = vpack.c.bf16 %v357_v26, %v355_v25  ;;  %v659_v23 = vpack.c.bf16 %v384_v22, %v382_v21  ;;  %v242_v25 = vrot.slane %v78_v24, %v89_v4  ;;  %v246_v26 = vrot.slane %v78_v24, %v93_v6 }
  0x83   :  { %628 = vmatpush1.bf16.msra.mxu0 %v627_v27 }
  0x84   :  { %588 = vmatpush1.bf16.msra.mxu1 %v587_v30  ;;  %v356_v30 = vld [vmem:[#allocation8 + $0x110] sm:$0xff]  ;;  %630 = vmatprep.subr.bf16.mxu0 %v629_v28 }
  0x85   :  { %590 = vmatprep.subr.bf16.mxu1 %v589_v31  ;;  %v359_v31 = vld [vmem:[#allocation8 + $0x128] sm:$0xff]  ;;  %v631_v33 = vpack.c.bf16 %v356_v30, %v354_v29 }
  0x87   :  { %632 = vmatpush1.bf16.msra.mxu0 %v631_v33  ;;  %v477_v33 = vld [vmem:[%s929_s5] sm:$0xff] }
  0x88   :  { %592 = vmatpush1.bf16.msra.mxu1 %v591_v34  ;;  %v633_v34 = vpack.c.bf16 %v361_v32, %v359_v31 }
  0x89   :  { %594 = vmatprep.subr.bf16.mxu1 %v593_v37  ;;  %v363_v37 = vld [vmem:[#allocation8 + $0x148] sm:$0xff] }
  0x8a   :  { %634 = vmatprep.subr.bf16.mxu0 %v633_v34  ;;  %v524_v34 = vld [vmem:[%s928_s4 + $0x4] ss:$0 sm:$0xff]  ;;  %s802_s4 = smov [#allocation10]  }
  0x8b   :  { %636 = vmatpush1.bf16.msra.mxu0 %v635_v39  ;;  %s512_s5 = sshll.u32 %s802_s4, 4  ;;  %s513_s5 = int_to_ptr.vmem [resolvable:$true] %s512_s5 }
  0x8c   :  { %596 = vmatpush1.bf16.msra.mxu1 %v595_v40  ;;  %v637_v40 = vpack.c.bf16 %v365_v38, %v363_v37  ;;  %v483_v37 = vand.u32 127, %v87_v2  ;;  %v487_v38 = vmul.f32 -0.5, %v477_v33  ;;  %s765_s28 = scalar_lea.vmem %s513_s5, 384  ;;  %p770_p5 = scmp.lt.s32.totalorder %s513_s5, %s513_s5 }
  0x8d   :  { %p766_p4 = scmp.ne.s32.totalorder %s513_s5, %s765_s28  ;;  %p771_p6 = scmp.lt.s32.totalorder %s765_s28, %s765_s28 }
  0x8e   :  { %638 = vmatprep.subr.bf16.mxu0 %v637_v40  ;;  %vm484_vm1 = vcmp.lt.s32.totalorder %v483_v37, 4  ;;  %v488_v44 = vmul.f32 %v487_v38, %v477_v33 }
  0x8f   :  { %640 = vmatpush1.bf16.msra.mxu0 %v639_v45  ;;  %p772_p7 = por %p771_p6, %p770_p5 }
  0x90   :  { %642 = vmatprep.subr.bf16.mxu0 %v641_v46  ;;  %v527_v46 = vsel %vm484_vm1, 1.0, %v801_v0 }
  0x91   :  { %p773_p8 = pnand %p772_p7, %p766_p4 }
  0x93   :  { %644 = vmatpush1.bf16.msra.mxu0 %v643_v51 }
  0x94   :  { %646 = vmatprep.subr.bf16.mxu0 %v645_v52 }
  0x97   :  { %648 = vmatpush1.bf16.msra.mxu0 %v647_v57 }
  0x98   :  { %650 = vmatprep.subr.bf16.mxu0 %v649_v58 }
  0x9b   :  { %652 = vmatpush1.bf16.msra.mxu0 %v651_v63 }
  0x9c   :  { %654 = vmatprep.subr.bf16.mxu0 %v653_v1 }
  0x9f   :  { %656 = vmatpush1.bf16.msra.mxu0 %v655_v17 }
  0xa0   :  { %658 = vmatprep.subr.bf16.mxu0 %v657_v20 }
  0xa3   :  { %660 = vmatpush1.bf16.msra.mxu0 %v659_v23 }
 0x123   :  { %v167_v9 = vpop.f32.mrb[0].mxu0 }
 0x124   :  { %v168_v10 = vadd.f32 %v167_v9, %v90_v7  ;;  %v169_v11 = vpop.f32.mrb[1].mxu0 }
 0x125   :  { %v170_v12 = vadd.f32 %v169_v11, %v94_v8 }
 0x126   :  { %v172_v14 = vmax.f32 %v168_v10, 0.0 }
 0x127   :  { %v173_v13 = vmax.f32 %v170_v12, 0.0 }
 0x129   :  { %313 = vmatprep.mubr.f32.mxu1 %v173_v13 }
 0x12a   :  { %314 = vmatmul.mubr.f32.vlgmr.msra.gmra.mrb[0].mxu1 %v172_v14 }
 0x1fd   :  { %v315_v27 = vpop.f32.mrb[0].mxu1 }
 0x1fe   :  { %v316_v28 = vadd.f32 %v315_v27, %v242_v25  ;;  %v317_v29 = vpop.f32.mrb[1].mxu1 }
 0x1ff   :  { %v318_v30 = vadd.f32 %v317_v29, %v246_v26 }
 0x200   :  { %v320_v32 = vmax.f32 %v316_v28, 0.0 }
 0x201   :  { %v321_v31 = vmax.f32 %v318_v30, 0.0 }
 0x203   :  { %450 = vmatprep.mubr.f32.mxu0 %v321_v31 }
 0x204   :  { %451 = vmatmul.mubr.f32.vlgmr.msra.gmra.mrb[2].mxu0 %v320_v32 }
 0x2d7   :  { %v452_v36 = vpop.f32.mrb[2].mxu0 }
 0x2d8   :  { %v463_v39 = vadd.f32 %v524_v34, %v452_v36  ;;  %v454_v40 = vpop.f32.mrb[3].mxu0 }
 0x2d9   :  { %v472_v41 = vadd.f32 %v526_v35, %v454_v40 }
 0x2da   :  { %v525_v42 = vclamps-f32 %v463_v39, 7.0 }
 0x2db   :  { %v473_v43 = vmax.f32 %v472_v41, -5.0 }
 0x2dc   :  { %669 = vtanh.f32 %v525_v42 }
 0x2dd   :  { %v474_v45 = vmin.f32 %v473_v43, 2.0 }
 0x2df   :  { %v475_v47 = vmul.f32 1.442695, %v474_v45  ;;  %v489_v48 = vsub.f32 %v488_v44, %v474_v45 }
 0x2e1   :  { %671 = vpow2.f32 %v475_v47  ;;  %v490_v49 = vmul.f32 %v527_v46, %v489_v48 }
 0x2e3   :  { %491 = vadd.xlane.f32.xlu0 %v490_v49 }
 0x2e6   :  { %v670_v50 = vpop.eup %669 }
 0x2e7   :  { %503 = vst [vmem:[#allocation10] sm:$0xff] %v670_v50 }
 0x2eb   :  { %v672_v51 = vpop.eup %671 }
 0x2ec   :  { %v478_v52 = vmul.f32 %v672_v51, %v477_v33 }
 0x2ee   :  { %v479_v53 = vadd.f32 %v525_v42, %v478_v52 }
 0x2f0   :  { %673 = vtanh.f32 %v479_v53 }
 0x2fa   :  { %v674_v54 = vpop.eup %673 }
 0x2fb   :  { %504 = vst [vmem:[#allocation10 + $0x8] sm:$0xff] %v674_v54  ;;  %v494_v55 = vmul.f32 %v674_v54, %v674_v54 }
 0x2fd   :  { %v495_v56 = vsub.f32 1.0, %v494_v55 }
 0x2ff   :  { %v496_v57 = vadd.f32 1e-06, %v495_v56 }
 0x301   :  { %675 = vlog2.f32 %v496_v57 }
 0x30b   :  { %v676_v58 = vpop.eup %675 }
 0x30c   :  { %v498_v59 = vmul.f32 0.6931472, %v676_v58 }
 0x30e   :  { %v499_v0 = vmul.f32 %v527_v46, %v498_v59 }
 0x310   :  { %500 = vadd.xlane.f32.xlu0 %v499_v0 }
 0x370   :  { %v492_v60 = vpop.xlane.xlu0 %491 }
 0x371   :  { %v528_v61 = vadd.f32 -3.675754, %v492_v60 }
 0x39d   :  { %v501_v62 = vpop.xlane.xlu0 %500 }
 0x39e   :  { %v502_v63 = vsub.f32 %v528_v61, %v501_v62 }
 0x3a0   :  { %505 = vst [vmem:[#allocation10 + $0x10] sm:$0xff] %v502_v63 }
 0x3a1   :  { %776 = shalt.err (!%p773_p8)
}
 0x3a2   :  { %s777_s9 = scalar_lea.hbm %s930_s6, 384 }
 0x3a3   :  { %p778_p9 = scmp.ne.s32.totalorder %s930_s6, %s777_s9  ;;  %p781_p10 = scmp.lt.u32.totalorder %s777_s9, %s930_s6 }
 0x3a5   :  { %p783_p11 = pnand %p781_p10, %p778_p9 }
 0x3a7   :  { %786 = shalt.err (!%p783_p11)
}
 0x3a8   :  { %515 = dma.vmem_to_hbm [thread:$0]  %s513_s5, 384, %s930_s6, [#allocation4]  }
 0x3a9   :  { %793 = dma.done.wait [#allocation4], 384  }
 0x3aa   :  { %794 = vsyncadd [#allocation4], 4294966912 }
 0x3ab   :  { %519 = vsyncpa [#allocation3], 1 }
 0x3ac   :  { %520 = vsyncpa [#allocation6], 1 }
 0x3ad   :  { %521 = vsyncpa [#allocation9], 1 }
 0x3ae   :  { %522 = vsyncpa [#allocation4], 1 }

</bundles_post_ra>
